<compile_context>
chip_gen: v7x
topology: tpu7x:2x2x1
jax: 0.10.0
libtpu: 0.0.40
codegen_flags: <defaults>
</compile_context>

<pallas_src>
import jax
import jax.numpy as jnp
from jax.experimental import pallas as pl
from jax.experimental.pallas import tpu as pltpu

D_MODEL = 32
N_HEADS = 4
D_HEAD = D_MODEL // N_HEADS
D_FF = 4 * D_MODEL          # d_ff defaults to 4 * d_model == 128 (lane-dense)
D_PAD = 128                 # channel axis padded to one full vreg lane width
SEQ = 8
BATCH = 2
EPS = 1e-5                  # PyTorch LayerNorm default eps

# Row indices inside the packed (16, 128) "vecs" operand.
R_MASK, R_BQKV, R_BO, R_G1, R_BE1, R_B1, R_B2, R_G2, R_BE2 = range(9)


def _masked_layernorm(z, mask, gamma, beta):
    """LayerNorm over the first D_MODEL lanes of a D_PAD-wide (zero-padded) tensor."""
    inv_n = 1.0 / D_MODEL
    mu = jnp.sum(z, axis=-1, keepdims=True) * inv_n          # pad lanes are zero
    c = (z - mu) * mask                                      # keep pad lanes at 0
    var = jnp.sum(c * c, axis=-1, keepdims=True) * inv_n
    return c * jax.lax.rsqrt(var + EPS) * gamma + beta       # gamma/beta zero-padded


def encoder_layer_kernel(x_ref, vec_ref, wqkv_ref, wo_ref, w1_ref, w2_ref, o_ref):
    BL = x_ref.shape[0]
    B = BL // SEQ
    x = x_ref[...]                          # (B*L, D_PAD), zeros in padded lanes
    vec = vec_ref[...]                      # (16, D_PAD) packed 1-row operands
    mask = vec[R_MASK:R_MASK + 1, :]
    bqkv = vec[R_BQKV:R_BQKV + 1, :]
    bo = vec[R_BO:R_BO + 1, :]
    g1 = vec[R_G1:R_G1 + 1, :]
    be1 = vec[R_BE1:R_BE1 + 1, :]
    b1 = vec[R_B1:R_B1 + 1, :]
    b2 = vec[R_B2:R_B2 + 1, :]
    g2 = vec[R_G2:R_G2 + 1, :]
    be2 = vec[R_BE2:R_BE2 + 1, :]

    # ---- fused, pre-scaled Q/K/V projection: one MXU pass, lane-dense ----
    qkv = jnp.dot(x, wqkv_ref[...], preferred_element_type=jnp.float32) + bqkv

    heads = []
    for h in range(N_HEADS):                # static 4-iter unroll
        q_off = h * D_HEAD
        k_off = D_MODEL + h * D_HEAD
        v_off = 2 * D_MODEL + h * D_HEAD
        qh = qkv[:, q_off:q_off + D_HEAD].reshape(B, SEQ, D_HEAD)   # (B, L, Dh)
        kh = qkv[:, k_off:k_off + D_HEAD].reshape(B, SEQ, D_HEAD)
        vh = qkv[:, v_off:v_off + D_HEAD].reshape(B, SEQ, D_HEAD)
        s = jnp.einsum('bqd,bkd->bqk', qh, kh,
                       preferred_element_type=jnp.float32)          # scale folded in Wq
        s = s - jnp.max(s, axis=-1, keepdims=True)
        p = jnp.exp(s)
        p = p / jnp.sum(p, axis=-1, keepdims=True)                  # exact normalization
        oh = jnp.einsum('bqk,bkd->bqd', p, vh,
                        preferred_element_type=jnp.float32)         # (B, L, Dh)
        heads.append(oh.reshape(BL, D_HEAD))

    attn = jnp.concatenate(heads, axis=-1)                          # (B*L, D_MODEL)
    new_x = jnp.dot(attn, wo_ref[...],
                    preferred_element_type=jnp.float32) + bo        # single Wo matmul

    # ---- residual + norm1 (dropout == identity, inference) ---------------
    x1 = _masked_layernorm(x + new_x, mask, g1, be1)

    # ---- pointwise FFN (Conv1d k=1 == linear over channels) --------------
    y = jnp.dot(x1, w1_ref[...], preferred_element_type=jnp.float32) + b1
    y = jnp.maximum(y, 0.0)                                         # relu activation
    y = jnp.dot(y, w2_ref[...], preferred_element_type=jnp.float32) + b2

    # ---- residual + norm2 -------------------------------------------------
    o_ref[...] = _masked_layernorm(x1 + y, mask, g2, be2)


def prepare_params(params):
    """One-time padding / fusing of weights into kernel-ready operands (hoisted
    out of the per-call hot path, reuse the result across calls)."""
    (wq, bq, wk, bk, wv, bv, wo, bo, g1, be1, w1, b1, w2, b2, g2, be2) = params
    assert D_FF == D_PAD, "d_ff must equal 128 for the lane-dense FFN path"
    scale = 1.0 / (D_HEAD ** 0.5)

    def pad_cols(a):                                   # zero-pad last dim to D_PAD
        return jnp.pad(a, ((0, 0), (0, D_PAD - a.shape[1])))

    # Fused QKV weight with 1/sqrt(Dh) folded into the Q columns.
    wqkv = jnp.concatenate([wq * scale, wk, wv], axis=1)                    # (D, 3D)
    wqkv = jnp.pad(wqkv, ((0, D_PAD - D_MODEL), (0, D_PAD - 3 * D_MODEL)))  # (128,128)
    bqkv = pad_cols(jnp.concatenate([bq * scale, bk, bv], axis=1))          # (1,128)

    wo_p = pad_cols(wo)                                # (D_MODEL, D_PAD)
    w1_p = jnp.pad(w1, ((0, D_PAD - D_MODEL), (0, 0)))  # (D_PAD, D_FF)
    w2_p = pad_cols(w2)                                # (D_FF, D_PAD)

    mask = (jnp.arange(D_PAD) < D_MODEL).astype(jnp.float32)[None, :]
    rows = [mask, bqkv, pad_cols(bo), pad_cols(g1), pad_cols(be1),
            b1, pad_cols(b2), pad_cols(g2), pad_cols(be2)]
    vecs = jnp.concatenate(rows, axis=0)               # (9, 128)
    vecs = jnp.pad(vecs, ((0, 16 - vecs.shape[0]), (0, 0)))  # (16, 128) sublane-aligned
    return (wqkv, wo_p, w1_p, w2_p, vecs)


@jax.jit
def encoder_layer(x, prep):
    wqkv, wo_p, w1_p, w2_p, vecs = prep
    B, L, D = x.shape
    x_p = jnp.pad(x.reshape(B * L, D), ((0, 0), (0, D_PAD - D)))   # (B*L, 128)

    flops = 2 * B * L * (D_PAD * D_PAD            # qkv
                         + D_MODEL * D_PAD        # wo
                         + D_PAD * D_FF           # ffn1
                         + D_FF * D_PAD)          # ffn2
    flops += 4 * B * N_HEADS * L * L * D_HEAD     # scores + p@v
    operands = (x_p, vecs, wqkv, wo_p, w1_p, w2_p)
    cost = pl.CostEstimate(
        flops=flops,
        transcendentals=B * N_HEADS * L * L + 4 * B * L,
        bytes_accessed=4 * (sum(int(a.size) for a in operands) + B * L * D_PAD))

    out = pl.pallas_call(
        encoder_layer_kernel,
        out_shape=jax.ShapeDtypeStruct((B * L, D_PAD), jnp.float32),
        in_specs=[pl.BlockSpec(memory_space=pltpu.MemorySpace.VMEM)] * len(operands),
        out_specs=pl.BlockSpec(memory_space=pltpu.MemorySpace.VMEM),
        cost_estimate=cost,
    )(*operands)
    return out[:, :D].reshape(B, L, D)


def make_params(key):
    ks = jax.random.split(key, 12)
    s = 0.05
    wq = jax.random.normal(ks[0], (D_MODEL, D_MODEL), jnp.float32) * s
    bq = jax.random.normal(ks[1], (1, D_MODEL), jnp.float32) * s
    wk = jax.random.normal(ks[2], (D_MODEL, D_MODEL), jnp.float32) * s
    bk = jax.random.normal(ks[3], (1, D_MODEL), jnp.float32) * s
    wv = jax.random.normal(ks[4], (D_MODEL, D_MODEL), jnp.float32) * s
    bv = jax.random.normal(ks[5], (1, D_MODEL), jnp.float32) * s
    wo = jax.random.normal(ks[6], (D_MODEL, D_MODEL), jnp.float32) * s
    bo = jax.random.normal(ks[7], (1, D_MODEL), jnp.float32) * s
    g1 = jnp.ones((1, D_MODEL), jnp.float32)
    be1 = jnp.zeros((1, D_MODEL), jnp.float32)
    w1 = jax.random.normal(ks[8], (D_MODEL, D_FF), jnp.float32) * s    # conv1 (k=1)
    b1 = jax.random.normal(ks[9], (1, D_FF), jnp.float32) * s
    w2 = jax.random.normal(ks[10], (D_FF, D_MODEL), jnp.float32) * s   # conv2 (k=1)
    b2 = jax.random.normal(ks[11], (1, D_MODEL), jnp.float32) * s
    g2 = jnp.ones((1, D_MODEL), jnp.float32)
    be2 = jnp.zeros((1, D_MODEL), jnp.float32)
    return (wq, bq, wk, bk, wv, bv, wo, bo, g1, be1, w1, b1, w2, b2, g2, be2)


def _layernorm_ref(x, gamma, beta):
    mu = jnp.mean(x, axis=-1, keepdims=True)
    var = jnp.mean((x - mu) ** 2, axis=-1, keepdims=True)
    return (x - mu) * jax.lax.rsqrt(var + EPS) * gamma + beta


def reference(x, params):
    hi = jax.lax.Precision.HIGHEST
    (wq, bq, wk, bk, wv, bv, wo, bo, g1, be1, w1, b1, w2, b2, g2, be2) = params
    B, L, D = x.shape
    q = (jnp.dot(x, wq, precision=hi) + bq).reshape(B, L, N_HEADS, D_HEAD).transpose(0, 2, 1, 3)
    k = (jnp.dot(x, wk, precision=hi) + bk).reshape(B, L, N_HEADS, D_HEAD).transpose(0, 2, 1, 3)
    v = (jnp.dot(x, wv, precision=hi) + bv).reshape(B, L, N_HEADS, D_HEAD).transpose(0, 2, 1, 3)
    s = jnp.einsum('bhqd,bhkd->bhqk', q, k, precision=hi) / jnp.sqrt(jnp.float32(D_HEAD))
    p = jax.nn.softmax(s, axis=-1)
    attn = jnp.einsum('bhqk,bhkd->bhqd', p, v,
                      precision=hi).transpose(0, 2, 1, 3).reshape(B, L, D)
    new_x = jnp.dot(attn, wo, precision=hi) + bo
    x1 = _layernorm_ref(x + new_x, g1, be1)
    y = jnp.maximum(jnp.dot(x1, w1, precision=hi) + b1, 0.0)
    y = jnp.dot(y, w2, precision=hi) + b2
    return _layernorm_ref(x1 + y, g2, be2)


if __name__ == "__main__":
    key = jax.random.PRNGKey(0)
    kx, kp = jax.random.split(key)
    x = jax.random.normal(kx, (BATCH, SEQ, D_MODEL), jnp.float32)
    params = make_params(kp)

    prep = prepare_params(params)          # one-time weight prep (hoisted)
    out = encoder_layer(x, prep)
    out = jax.block_until_ready(out)

    ref = reference(x, params)
    assert out.shape == (BATCH, SEQ, D_MODEL)
    # Tolerance covers MXU default-precision matmul differences between the
    # Pallas lowering and the (HIGHEST-precision) XLA reference; the softmax
    # itself now uses exact normalization.
    assert jnp.allclose(out, ref, atol=2e-3, rtol=2e-3), "mismatch vs JAX reference"
    # TODO(synk): dropout layers are treated as identity (inference mode only).
    print("KERNEL_OK")
</pallas_src>

<mosaic_0001>
module attributes {stable_mosaic.version = 11 : i64} {
  func.func @encoder_layer_kernel(%arg0: memref<16x128xf32, #tpu.memory_space<vmem>>, %arg1: memref<16x128xf32, #tpu.memory_space<vmem>>, %arg2: memref<128x128xf32, #tpu.memory_space<vmem>>, %arg3: memref<32x128xf32, #tpu.memory_space<vmem>>, %arg4: memref<128x128xf32, #tpu.memory_space<vmem>>, %arg5: memref<128x128xf32, #tpu.memory_space<vmem>>, %arg6: memref<16x128xf32, #tpu.memory_space<vmem>>) attributes {dimension_semantics = [], scalar_prefetch = 0 : i64, scratch_operands = 0 : i64, tpu.core_type = #tpu.core_type<tc>} {
    %c0 = arith.constant 0 : index
    %c0_0 = arith.constant 0 : index
    %0 = vector.load %arg0[%c0, %c0_0] : memref<16x128xf32, #tpu.memory_space<vmem>>, vector<16x128xf32>
    %c0_1 = arith.constant 0 : index
    %c0_2 = arith.constant 0 : index
    %1 = vector.load %arg1[%c0_1, %c0_2] : memref<16x128xf32, #tpu.memory_space<vmem>>, vector<16x128xf32>
    %2 = vector.extract_strided_slice %1 {offsets = [0, 0], sizes = [1, 128], strides = [1, 1]} : vector<16x128xf32> to vector<1x128xf32>
    %3 = vector.extract_strided_slice %1 {offsets = [1, 0], sizes = [1, 128], strides = [1, 1]} : vector<16x128xf32> to vector<1x128xf32>
    %4 = vector.extract_strided_slice %1 {offsets = [2, 0], sizes = [1, 128], strides = [1, 1]} : vector<16x128xf32> to vector<1x128xf32>
    %5 = vector.extract_strided_slice %1 {offsets = [3, 0], sizes = [1, 128], strides = [1, 1]} : vector<16x128xf32> to vector<1x128xf32>
    %6 = vector.extract_strided_slice %1 {offsets = [4, 0], sizes = [1, 128], strides = [1, 1]} : vector<16x128xf32> to vector<1x128xf32>
    %7 = vector.extract_strided_slice %1 {offsets = [5, 0], sizes = [1, 128], strides = [1, 1]} : vector<16x128xf32> to vector<1x128xf32>
    %8 = vector.extract_strided_slice %1 {offsets = [6, 0], sizes = [1, 128], strides = [1, 1]} : vector<16x128xf32> to vector<1x128xf32>
    %9 = vector.extract_strided_slice %1 {offsets = [7, 0], sizes = [1, 128], strides = [1, 1]} : vector<16x128xf32> to vector<1x128xf32>
    %10 = vector.extract_strided_slice %1 {offsets = [8, 0], sizes = [1, 128], strides = [1, 1]} : vector<16x128xf32> to vector<1x128xf32>
    %c0_3 = arith.constant 0 : index
    %c0_4 = arith.constant 0 : index
    %11 = vector.load %arg2[%c0_3, %c0_4] : memref<128x128xf32, #tpu.memory_space<vmem>>, vector<128x128xf32>
    %cst = arith.constant dense<0.000000e+00> : vector<16x128xf32>
    %12 = tpu.matmul %0, %11, %cst {dimension_numbers = #tpu.dot_dimension_numbers<[1], [0], [0], [1], [0, 0, 1, 1], [], []>} : vector<16x128xf32>, vector<128x128xf32>, vector<16x128xf32> -> vector<16x128xf32>
    %13 = vector.broadcast %3 : vector<1x128xf32> to vector<16x128xf32>
    %14 = arith.addf %12, %13 : vector<16x128xf32>
    %15 = vector.extract_strided_slice %14 {offsets = [0, 0], sizes = [16, 8], strides = [1, 1]} : vector<16x128xf32> to vector<16x8xf32>
    %16 = vector.shape_cast %15 : vector<16x8xf32> to vector<2x8x8xf32>
    %17 = vector.extract_strided_slice %14 {offsets = [0, 32], sizes = [16, 8], strides = [1, 1]} : vector<16x128xf32> to vector<16x8xf32>
    %18 = vector.shape_cast %17 : vector<16x8xf32> to vector<2x8x8xf32>
    %19 = vector.extract_strided_slice %14 {offsets = [0, 64], sizes = [16, 8], strides = [1, 1]} : vector<16x128xf32> to vector<16x8xf32>
    %20 = vector.shape_cast %19 : vector<16x8xf32> to vector<2x8x8xf32>
    "tpu.trace_start"() <{level = 10 : i32, message = "bqd,bkd->bqk"}> : () -> ()
    %cst_5 = arith.constant dense<0.000000e+00> : vector<2x8x8xf32>
    %21 = tpu.matmul %16, %18, %cst_5 {dimension_numbers = #tpu.dot_dimension_numbers<[2], [2], [1], [1], [0, 0, 0, 1, 1, 1], [0], [0]>} : vector<2x8x8xf32>, vector<2x8x8xf32>, vector<2x8x8xf32> -> vector<2x8x8xf32>
    "tpu.trace_stop"() : () -> ()
    %cst_6 = arith.constant dense<0xFF800000> : vector<2x8xf32>
    %22 = vector.multi_reduction <maximumf>, %21, %cst_6 [2] : vector<2x8x8xf32> to vector<2x8xf32>
    %23 = vector.shape_cast %22 : vector<2x8xf32> to vector<2x8x1xf32>
    %24 = vector.broadcast %23 : vector<2x8x1xf32> to vector<2x8x8xf32>
    %25 = arith.subf %21, %24 : vector<2x8x8xf32>
    %26 = math.exp %25 : vector<2x8x8xf32>
    %cst_7 = arith.constant dense<0.000000e+00> : vector<2x8xf32>
    %27 = vector.multi_reduction <add>, %26, %cst_7 [2] : vector<2x8x8xf32> to vector<2x8xf32>
    %28 = vector.shape_cast %27 : vector<2x8xf32> to vector<2x8x1xf32>
    %29 = vector.broadcast %28 : vector<2x8x1xf32> to vector<2x8x8xf32>
    %30 = arith.divf %26, %29 : vector<2x8x8xf32>
    "tpu.trace_start"() <{level = 10 : i32, message = "bqk,bkd->bqd"}> : () -> ()
    %cst_8 = arith.constant dense<0.000000e+00> : vector<2x8x8xf32>
    %31 = tpu.matmul %30, %20, %cst_8 {dimension_numbers = #tpu.dot_dimension_numbers<[2], [1], [1], [2], [0, 0, 0, 1, 1, 2], [0], [0]>} : vector<2x8x8xf32>, vector<2x8x8xf32>, vector<2x8x8xf32> -> vector<2x8x8xf32>
    "tpu.trace_stop"() : () -> ()
    %32 = vector.shape_cast %31 : vector<2x8x8xf32> to vector<16x8xf32>
    %33 = vector.extract_strided_slice %14 {offsets = [0, 8], sizes = [16, 8], strides = [1, 1]} : vector<16x128xf32> to vector<16x8xf32>
    %34 = vector.shape_cast %33 : vector<16x8xf32> to vector<2x8x8xf32>
    %35 = vector.extract_strided_slice %14 {offsets = [0, 40], sizes = [16, 8], strides = [1, 1]} : vector<16x128xf32> to vector<16x8xf32>
    %36 = vector.shape_cast %35 : vector<16x8xf32> to vector<2x8x8xf32>
    %37 = vector.extract_strided_slice %14 {offsets = [0, 72], sizes = [16, 8], strides = [1, 1]} : vector<16x128xf32> to vector<16x8xf32>
    %38 = vector.shape_cast %37 : vector<16x8xf32> to vector<2x8x8xf32>
    "tpu.trace_start"() <{level = 10 : i32, message = "bqd,bkd->bqk"}> : () -> ()
    %cst_9 = arith.constant dense<0.000000e+00> : vector<2x8x8xf32>
    %39 = tpu.matmul %34, %36, %cst_9 {dimension_numbers = #tpu.dot_dimension_numbers<[2], [2], [1], [1], [0, 0, 0, 1, 1, 1], [0], [0]>} : vector<2x8x8xf32>, vector<2x8x8xf32>, vector<2x8x8xf32> -> vector<2x8x8xf32>
    "tpu.trace_stop"() : () -> ()
    %cst_10 = arith.constant dense<0xFF800000> : vector<2x8xf32>
    %40 = vector.multi_reduction <maximumf>, %39, %cst_10 [2] : vector<2x8x8xf32> to vector<2x8xf32>
    %41 = vector.shape_cast %40 : vector<2x8xf32> to vector<2x8x1xf32>
    %42 = vector.broadcast %41 : vector<2x8x1xf32> to vector<2x8x8xf32>
    %43 = arith.subf %39, %42 : vector<2x8x8xf32>
    %44 = math.exp %43 : vector<2x8x8xf32>
    %cst_11 = arith.constant dense<0.000000e+00> : vector<2x8xf32>
    %45 = vector.multi_reduction <add>, %44, %cst_11 [2] : vector<2x8x8xf32> to vector<2x8xf32>
    %46 = vector.shape_cast %45 : vector<2x8xf32> to vector<2x8x1xf32>
    %47 = vector.broadcast %46 : vector<2x8x1xf32> to vector<2x8x8xf32>
    %48 = arith.divf %44, %47 : vector<2x8x8xf32>
    "tpu.trace_start"() <{level = 10 : i32, message = "bqk,bkd->bqd"}> : () -> ()
    %cst_12 = arith.constant dense<0.000000e+00> : vector<2x8x8xf32>
    %49 = tpu.matmul %48, %38, %cst_12 {dimension_numbers = #tpu.dot_dimension_numbers<[2], [1], [1], [2], [0, 0, 0, 1, 1, 2], [0], [0]>} : vector<2x8x8xf32>, vector<2x8x8xf32>, vector<2x8x8xf32> -> vector<2x8x8xf32>
    "tpu.trace_stop"() : () -> ()
    %50 = vector.shape_cast %49 : vector<2x8x8xf32> to vector<16x8xf32>
    %51 = vector.extract_strided_slice %14 {offsets = [0, 16], sizes = [16, 8], strides = [1, 1]} : vector<16x128xf32> to vector<16x8xf32>
    %52 = vector.shape_cast %51 : vector<16x8xf32> to vector<2x8x8xf32>
    %53 = vector.extract_strided_slice %14 {offsets = [0, 48], sizes = [16, 8], strides = [1, 1]} : vector<16x128xf32> to vector<16x8xf32>
    %54 = vector.shape_cast %53 : vector<16x8xf32> to vector<2x8x8xf32>
    %55 = vector.extract_strided_slice %14 {offsets = [0, 80], sizes = [16, 8], strides = [1, 1]} : vector<16x128xf32> to vector<16x8xf32>
    %56 = vector.shape_cast %55 : vector<16x8xf32> to vector<2x8x8xf32>
    "tpu.trace_start"() <{level = 10 : i32, message = "bqd,bkd->bqk"}> : () -> ()
    %cst_13 = arith.constant dense<0.000000e+00> : vector<2x8x8xf32>
    %57 = tpu.matmul %52, %54, %cst_13 {dimension_numbers = #tpu.dot_dimension_numbers<[2], [2], [1], [1], [0, 0, 0, 1, 1, 1], [0], [0]>} : vector<2x8x8xf32>, vector<2x8x8xf32>, vector<2x8x8xf32> -> vector<2x8x8xf32>
    "tpu.trace_stop"() : () -> ()
    %cst_14 = arith.constant dense<0xFF800000> : vector<2x8xf32>
    %58 = vector.multi_reduction <maximumf>, %57, %cst_14 [2] : vector<2x8x8xf32> to vector<2x8xf32>
    %59 = vector.shape_cast %58 : vector<2x8xf32> to vector<2x8x1xf32>
    %60 = vector.broadcast %59 : vector<2x8x1xf32> to vector<2x8x8xf32>
    %61 = arith.subf %57, %60 : vector<2x8x8xf32>
    %62 = math.exp %61 : vector<2x8x8xf32>
    %cst_15 = arith.constant dense<0.000000e+00> : vector<2x8xf32>
    %63 = vector.multi_reduction <add>, %62, %cst_15 [2] : vector<2x8x8xf32> to vector<2x8xf32>
    %64 = vector.shape_cast %63 : vector<2x8xf32> to vector<2x8x1xf32>
    %65 = vector.broadcast %64 : vector<2x8x1xf32> to vector<2x8x8xf32>
    %66 = arith.divf %62, %65 : vector<2x8x8xf32>
    "tpu.trace_start"() <{level = 10 : i32, message = "bqk,bkd->bqd"}> : () -> ()
    %cst_16 = arith.constant dense<0.000000e+00> : vector<2x8x8xf32>
    %67 = tpu.matmul %66, %56, %cst_16 {dimension_numbers = #tpu.dot_dimension_numbers<[2], [1], [1], [2], [0, 0, 0, 1, 1, 2], [0], [0]>} : vector<2x8x8xf32>, vector<2x8x8xf32>, vector<2x8x8xf32> -> vector<2x8x8xf32>
    "tpu.trace_stop"() : () -> ()
    %68 = vector.shape_cast %67 : vector<2x8x8xf32> to vector<16x8xf32>
    %69 = vector.extract_strided_slice %14 {offsets = [0, 24], sizes = [16, 8], strides = [1, 1]} : vector<16x128xf32> to vector<16x8xf32>
    %70 = vector.shape_cast %69 : vector<16x8xf32> to vector<2x8x8xf32>
    %71 = vector.extract_strided_slice %14 {offsets = [0, 56], sizes = [16, 8], strides = [1, 1]} : vector<16x128xf32> to vector<16x8xf32>
    %72 = vector.shape_cast %71 : vector<16x8xf32> to vector<2x8x8xf32>
    %73 = vector.extract_strided_slice %14 {offsets = [0, 88], sizes = [16, 8], strides = [1, 1]} : vector<16x128xf32> to vector<16x8xf32>
    %74 = vector.shape_cast %73 : vector<16x8xf32> to vector<2x8x8xf32>
    "tpu.trace_start"() <{level = 10 : i32, message = "bqd,bkd->bqk"}> : () -> ()
    %cst_17 = arith.constant dense<0.000000e+00> : vector<2x8x8xf32>
    %75 = tpu.matmul %70, %72, %cst_17 {dimension_numbers = #tpu.dot_dimension_numbers<[2], [2], [1], [1], [0, 0, 0, 1, 1, 1], [0], [0]>} : vector<2x8x8xf32>, vector<2x8x8xf32>, vector<2x8x8xf32> -> vector<2x8x8xf32>
    "tpu.trace_stop"() : () -> ()
    %cst_18 = arith.constant dense<0xFF800000> : vector<2x8xf32>
    %76 = vector.multi_reduction <maximumf>, %75, %cst_18 [2] : vector<2x8x8xf32> to vector<2x8xf32>
    %77 = vector.shape_cast %76 : vector<2x8xf32> to vector<2x8x1xf32>
    %78 = vector.broadcast %77 : vector<2x8x1xf32> to vector<2x8x8xf32>
    %79 = arith.subf %75, %78 : vector<2x8x8xf32>
    %80 = math.exp %79 : vector<2x8x8xf32>
    %cst_19 = arith.constant dense<0.000000e+00> : vector<2x8xf32>
    %81 = vector.multi_reduction <add>, %80, %cst_19 [2] : vector<2x8x8xf32> to vector<2x8xf32>
    %82 = vector.shape_cast %81 : vector<2x8xf32> to vector<2x8x1xf32>
    %83 = vector.broadcast %82 : vector<2x8x1xf32> to vector<2x8x8xf32>
    %84 = arith.divf %80, %83 : vector<2x8x8xf32>
    "tpu.trace_start"() <{level = 10 : i32, message = "bqk,bkd->bqd"}> : () -> ()
    %cst_20 = arith.constant dense<0.000000e+00> : vector<2x8x8xf32>
    %85 = tpu.matmul %84, %74, %cst_20 {dimension_numbers = #tpu.dot_dimension_numbers<[2], [1], [1], [2], [0, 0, 0, 1, 1, 2], [0], [0]>} : vector<2x8x8xf32>, vector<2x8x8xf32>, vector<2x8x8xf32> -> vector<2x8x8xf32>
    "tpu.trace_stop"() : () -> ()
    %86 = vector.shape_cast %85 : vector<2x8x8xf32> to vector<16x8xf32>
    %87 = tpu.concatenate %32, %50, %68, %86 in 1 : vector<16x8xf32>, vector<16x8xf32>, vector<16x8xf32>, vector<16x8xf32> -> vector<16x32xf32>
    %c0_21 = arith.constant 0 : index
    %c0_22 = arith.constant 0 : index
    %88 = vector.load %arg3[%c0_21, %c0_22] : memref<32x128xf32, #tpu.memory_space<vmem>>, vector<32x128xf32>
    %cst_23 = arith.constant dense<0.000000e+00> : vector<16x128xf32>
    %89 = tpu.matmul %87, %88, %cst_23 {dimension_numbers = #tpu.dot_dimension_numbers<[1], [0], [0], [1], [0, 0, 1, 1], [], []>} : vector<16x32xf32>, vector<32x128xf32>, vector<16x128xf32> -> vector<16x128xf32>
    %90 = vector.broadcast %4 : vector<1x128xf32> to vector<16x128xf32>
    %91 = arith.addf %89, %90 : vector<16x128xf32>
    %92 = arith.addf %0, %91 : vector<16x128xf32>
    %cst_24 = arith.constant dense<0.000000e+00> : vector<16xf32>
    %93 = vector.multi_reduction <add>, %92, %cst_24 [1] : vector<16x128xf32> to vector<16xf32>
    %94 = vector.shape_cast %93 : vector<16xf32> to vector<16x1xf32>
    %cst_25 = arith.constant 3.125000e-02 : f32
    %95 = vector.broadcast %cst_25 : f32 to vector<16x1xf32>
    %96 = arith.mulf %94, %95 : vector<16x1xf32>
    %97 = vector.broadcast %96 : vector<16x1xf32> to vector<16x128xf32>
    %98 = arith.subf %92, %97 : vector<16x128xf32>
    %99 = vector.broadcast %2 : vector<1x128xf32> to vector<16x128xf32>
    %100 = arith.mulf %98, %99 : vector<16x128xf32>
    %101 = arith.mulf %100, %100 : vector<16x128xf32>
    %cst_26 = arith.constant dense<0.000000e+00> : vector<16xf32>
    %102 = vector.multi_reduction <add>, %101, %cst_26 [1] : vector<16x128xf32> to vector<16xf32>
    %103 = vector.shape_cast %102 : vector<16xf32> to vector<16x1xf32>
    %cst_27 = arith.constant 3.125000e-02 : f32
    %104 = vector.broadcast %cst_27 : f32 to vector<16x1xf32>
    %105 = arith.mulf %103, %104 : vector<16x1xf32>
    %cst_28 = arith.constant 9.99999974E-6 : f32
    %106 = vector.broadcast %cst_28 : f32 to vector<16x1xf32>
    %107 = arith.addf %105, %106 : vector<16x1xf32>
    %108 = math.rsqrt %107 : vector<16x1xf32>
    %109 = vector.broadcast %108 : vector<16x1xf32> to vector<16x128xf32>
    %110 = arith.mulf %100, %109 : vector<16x128xf32>
    %111 = vector.broadcast %5 : vector<1x128xf32> to vector<16x128xf32>
    %112 = arith.mulf %110, %111 : vector<16x128xf32>
    %113 = vector.broadcast %6 : vector<1x128xf32> to vector<16x128xf32>
    %114 = arith.addf %112, %113 : vector<16x128xf32>
    %c0_29 = arith.constant 0 : index
    %c0_30 = arith.constant 0 : index
    %115 = vector.load %arg4[%c0_29, %c0_30] : memref<128x128xf32, #tpu.memory_space<vmem>>, vector<128x128xf32>
    %cst_31 = arith.constant dense<0.000000e+00> : vector<16x128xf32>
    %116 = tpu.matmul %114, %115, %cst_31 {dimension_numbers = #tpu.dot_dimension_numbers<[1], [0], [0], [1], [0, 0, 1, 1], [], []>} : vector<16x128xf32>, vector<128x128xf32>, vector<16x128xf32> -> vector<16x128xf32>
    %117 = vector.broadcast %7 : vector<1x128xf32> to vector<16x128xf32>
    %118 = arith.addf %116, %117 : vector<16x128xf32>
    %cst_32 = arith.constant 0.000000e+00 : f32
    %119 = vector.broadcast %cst_32 : f32 to vector<16x128xf32>
    %120 = arith.maximumf %118, %119 : vector<16x128xf32>
    %c0_33 = arith.constant 0 : index
    %c0_34 = arith.constant 0 : index
    %121 = vector.load %arg5[%c0_33, %c0_34] : memref<128x128xf32, #tpu.memory_space<vmem>>, vector<128x128xf32>
    %cst_35 = arith.constant dense<0.000000e+00> : vector<16x128xf32>
    %122 = tpu.matmul %120, %121, %cst_35 {dimension_numbers = #tpu.dot_dimension_numbers<[1], [0], [0], [1], [0, 0, 1, 1], [], []>} : vector<16x128xf32>, vector<128x128xf32>, vector<16x128xf32> -> vector<16x128xf32>
    %123 = vector.broadcast %8 : vector<1x128xf32> to vector<16x128xf32>
    %124 = arith.addf %122, %123 : vector<16x128xf32>
    %125 = arith.addf %114, %124 : vector<16x128xf32>
    %cst_36 = arith.constant dense<0.000000e+00> : vector<16xf32>
    %126 = vector.multi_reduction <add>, %125, %cst_36 [1] : vector<16x128xf32> to vector<16xf32>
    %127 = vector.shape_cast %126 : vector<16xf32> to vector<16x1xf32>
    %cst_37 = arith.constant 3.125000e-02 : f32
    %128 = vector.broadcast %cst_37 : f32 to vector<16x1xf32>
    %129 = arith.mulf %127, %128 : vector<16x1xf32>
    %130 = vector.broadcast %129 : vector<16x1xf32> to vector<16x128xf32>
    %131 = arith.subf %125, %130 : vector<16x128xf32>
    %132 = vector.broadcast %2 : vector<1x128xf32> to vector<16x128xf32>
    %133 = arith.mulf %131, %132 : vector<16x128xf32>
    %134 = arith.mulf %133, %133 : vector<16x128xf32>
    %cst_38 = arith.constant dense<0.000000e+00> : vector<16xf32>
    %135 = vector.multi_reduction <add>, %134, %cst_38 [1] : vector<16x128xf32> to vector<16xf32>
    %136 = vector.shape_cast %135 : vector<16xf32> to vector<16x1xf32>
    %cst_39 = arith.constant 3.125000e-02 : f32
    %137 = vector.broadcast %cst_39 : f32 to vector<16x1xf32>
    %138 = arith.mulf %136, %137 : vector<16x1xf32>
    %cst_40 = arith.constant 9.99999974E-6 : f32
    %139 = vector.broadcast %cst_40 : f32 to vector<16x1xf32>
    %140 = arith.addf %138, %139 : vector<16x1xf32>
    %141 = math.rsqrt %140 : vector<16x1xf32>
    %142 = vector.broadcast %141 : vector<16x1xf32> to vector<16x128xf32>
    %143 = arith.mulf %133, %142 : vector<16x128xf32>
    %144 = vector.broadcast %9 : vector<1x128xf32> to vector<16x128xf32>
    %145 = arith.mulf %143, %144 : vector<16x128xf32>
    %146 = vector.broadcast %10 : vector<1x128xf32> to vector<16x128xf32>
    %147 = arith.addf %145, %146 : vector<16x128xf32>
    %c0_41 = arith.constant 0 : index
    %c0_42 = arith.constant 0 : index
    %148 = vector.load %arg6[%c0_41, %c0_42] : memref<16x128xf32, #tpu.memory_space<vmem>>, vector<16x128xf32>
    tpu.vector_store %arg6[%c0_41, %c0_42], %147 {strides = array<i32>} : memref<16x128xf32, #tpu.memory_space<vmem>>, vector<16x128xf32>,
    return
  }
}

</mosaic_0001>

<bundles_post_ra>
// kernel: encoder_layer.1
= control target key start
LH: loop header
LB: loop body
LE: loop exit
PB: predicated region body
PF: predicated region fallthrough
CT: control target
= control target key end

     0   :  { %11 = vsyncpa [#allocation3], 0  ;;  %s2749_s0 = inlined_call_operand.vmem [shape: f32[16,128], index: 0, kind: input, shape index: {}]   ;;  %s2750_s1 = inlined_call_operand.vmem [shape: f32[16,128], index: 1, kind: input, shape index: {}]   ;;  %s2751_s2 = inlined_call_operand.hbm [shape: f32[128,128], index: 2, kind: input, shape index: {}]   ;;  %s2752_s3 = inlined_call_operand.vmem [shape: f32[32,128], index: 3, kind: input, shape index: {}]   ;;  %s2753_s4 = inlined_call_operand.hbm [shape: f32[128,128], index: 4, kind: input, shape index: {}]   ;;  %s2754_s5 = inlined_call_operand.hbm [shape: f32[128,128], index: 5, kind: input, shape index: {}]   ;;  %s2755_s6 = inlined_call_operand.vmem [shape: f32[16,128], index: 6, kind: output, shape index: {}]  }
   0x1   :  { %12 = vsyncpa [#allocation5], 0  ;;  %s2432_s21 = smov [#allocation4]   ;;  %s2433_s23 = smov [#allocation2]  }
   0x2   :  { %s36_s22 = sshll.u32 %s2432_s21, 4  ;;  %s22_s24 = sshll.u32 %s2433_s23, 4  ;;  %s37_s22 = int_to_ptr.vmem [resolvable:$true] %s36_s22  ;;  %s2487_s24 = int_to_ptr.vmem [resolvable:$true] %s22_s24 }
   0x3   :  { %s2362_s27 = scalar_lea.hbm %s2753_s4, 2048 }
   0x4   :  { %p2363_p0 = scmp.ne.s32.totalorder %s2753_s4, %s2362_s27  ;;  %p2366_p1 = scmp.lt.u32.totalorder %s2362_s27, %s2753_s4 }
   0x6   :  { %p2368_p2 = pnand %p2366_p1, %p2363_p0 }
   0x8   :  { %2371 = shalt.err (!%p2368_p2)
}
   0x9   :  { %s2372_s8 = scalar_lea.vmem %s37_s22, 2048  ;;  %p2377_p4 = scmp.lt.s32.totalorder %s37_s22, %s37_s22 }
   0xa   :  { %p2373_p3 = scmp.ne.s32.totalorder %s37_s22, %s2372_s8  ;;  %p2378_p5 = scmp.lt.s32.totalorder %s2372_s8, %s2372_s8 }
   0xc   :  { %p2379_p6 = por %p2378_p5, %p2377_p4 }
   0xe   :  { %p2380_p7 = pnand %p2379_p6, %p2373_p3 }
  0x10   :  { %2383 = shalt.err (!%p2380_p7)
}
  0x11   :  { %s2434_s9 = smov 128   ;;  %s2435_s10 = smov 8  }
  0x12   :  { %42 = dma.hbm_to_vmem [thread:$0]  %s2753_s4, 2048, %s37_s22, [#allocation5], %s2434_s9, %s2434_s9, %s2435_s10  }
  0x13   :  { %s2384_s15 = scalar_lea.hbm %s2751_s2, 2048 }
  0x14   :  { %p2385_p8 = scmp.ne.s32.totalorder %s2751_s2, %s2384_s15  ;;  %p2388_p9 = scmp.lt.u32.totalorder %s2384_s15, %s2751_s2 }
  0x16   :  { %p2390_p10 = pnand %p2388_p9, %p2385_p8 }
  0x18   :  { %2393 = shalt.err (!%p2390_p10)
}
  0x19   :  { %s2394_s20 = scalar_lea.vmem %s2487_s24, 2048  ;;  %p2399_p12 = scmp.lt.s32.totalorder %s2487_s24, %s2487_s24 }
  0x1a   :  { %p2395_p11 = scmp.ne.s32.totalorder %s2487_s24, %s2394_s20  ;;  %p2400_p13 = scmp.lt.s32.totalorder %s2394_s20, %s2394_s20 }
  0x1c   :  { %p2401_p0 = por %p2400_p13, %p2399_p12 }
  0x1e   :  { %p2402_p1 = pnand %p2401_p0, %p2395_p11 }
  0x20   :  { %2405 = shalt.err (!%p2402_p1)
}
  0x21   :  { %28 = dma.hbm_to_vmem [thread:$0]  %s2751_s2, 2048, %s2487_s24, [#allocation3], %s2434_s9, %s2434_s9, %s2435_s10  }
  0x22   :  { %s2436_s22 = smov [#allocation6]   ;;  %s2406_s27 = scalar_lea.hbm %s2754_s5, 2048 }
  0x23   :  { %s48_s23 = sshll.u32 %s2436_s22, 4  ;;  %p2407_p2 = scmp.ne.s32.totalorder %s2754_s5, %s2406_s27  ;;  %s49_s23 = int_to_ptr.vmem [resolvable:$true] %s48_s23 }
  0x24   :  { %p2410_p3 = scmp.lt.u32.totalorder %s2406_s27, %s2754_s5 }
  0x26   :  { %p2412_p4 = pnand %p2410_p3, %p2407_p2 }
  0x28   :  { %2415 = shalt.err (!%p2412_p4)
}
  0x29   :  { %s2416_s8 = scalar_lea.vmem %s49_s23, 2048  ;;  %p2421_p6 = scmp.lt.s32.totalorder %s49_s23, %s49_s23 }
  0x2a   :  { %p2417_p5 = scmp.ne.s32.totalorder %s49_s23, %s2416_s8  ;;  %p2422_p7 = scmp.lt.s32.totalorder %s2416_s8, %s2416_s8 }
  0x2c   :  { %p2423_p8 = por %p2422_p7, %p2421_p6 }
  0x2e   :  { %p2424_p9 = pnand %p2423_p8, %p2417_p5 }
  0x30   :  { %2427 = shalt.err (!%p2424_p9)
}
  0x31   :  { %54 = dma.hbm_to_vmem [thread:$0]  %s2754_s5, 2048, %s49_s23, [#allocation5], %s2434_s9, %s2434_s9, %s2435_s10  }
  0x32   :  { %2428 = dma.done.wait [#allocation3], 2048  }
  0x33   :  { %2429 = vsyncadd [#allocation3], 4294965248 }
  0x34   :  { %2430 = dma.done.wait [#allocation5], 4096  }
  0x35   :  { %2431 = vsyncadd [#allocation5], 4294963200  ;;  %v68_v0 = vld [vmem:[#allocation2] sm:$0xff]  ;;  %v69_v1 = vld [vmem:[#allocation2 + $0x8] sm:$0xff]  ;;  %v2437_v26 = vmov 0.0   ;;  %v84_v27 = vlaneseq  ;;  %vm2438_vm0 = vmmov 0  }
  0x36   :  { %v70_v2 = vld [vmem:[#allocation2 + $0x10] sm:$0xff]  ;;  %v2198_v3 = vpack.c.bf16 %v69_v1, %v68_v0  ;;  %v71_v4 = vld [vmem:[#allocation2 + $0x18] sm:$0xff]  ;;  %v72_v6 = vld [vmem:[#allocation2 + $0x20] sm:$0xff]  ;;  %2037 = vmatprep.subr.mxu1 %v2437_v26  ;;  %2039 = vmatprep.mubr.msk.f32.mxu1 %vm2438_vm0, %v2437_v26  ;;  %s2439_s14 = smov 96   ;;  %vm166_vm1 = vcmask 64512   ;;  %s2440_s15 = smov 64  }
  0x37   :  { %v2202_v5 = vpack.c.bf16 %v71_v4, %v70_v2  ;;  %v73_v7 = vld [vmem:[#allocation2 + $0x28] sm:$0xff]  ;;  %v2542_v9 = vld [vmem:[%s2749_s0] sm:$0xff]  ;;  %v74_v10 = vld [vmem:[#allocation2 + $0x30] sm:$0xff]  ;;  %v2553_v28 = vshrl.u32 %v84_v27, 7  ;;  %s2441_s16 = smov 88   ;;  %s2442_s17 = smov 120  }
  0x38   :  { %2199 = vmatprep.subr.bf16.mxu0 %v2198_v3  ;;  %v2206_v8 = vpack.c.bf16 %v73_v7, %v72_v6  ;;  %v75_v11 = vld [vmem:[#allocation2 + $0x38] sm:$0xff]  ;;  %2034 = vmatprep.mubr.f32.mxu0 %v2542_v9  ;;  %v76_v13 = vld [vmem:[#allocation2 + $0x40] sm:$0xff]  ;;  %v77_v14 = vld [vmem:[#allocation2 + $0x48] sm:$0xff]  ;;  %s2443_s18 = smov 56   ;;  %s2444_s19 = smov 80   ;;  %vm1511_vm2 = vcmask 195584  }
  0x39   :  { %2201 = vmatpush3.bf16.msra.mxu0 %v2198_v3  ;;  %v2210_v12 = vpack.c.bf16 %v75_v11, %v74_v10  ;;  %v2214_v15 = vpack.c.bf16 %v77_v14, %v76_v13  ;;  %v78_v16 = vld [vmem:[#allocation2 + $0x50] sm:$0xff]  ;;  %v79_v17 = vld [vmem:[#allocation2 + $0x58] sm:$0xff]  ;;  %v80_v19 = vld [vmem:[#allocation2 + $0x60] sm:$0xff]  ;;  %v86_v29 = vsub.s32 1, %v2553_v28  ;;  %s2445_s20 = smov 112   ;;  %s2446_s4 = smov 48  }
  0x3a   :  { %2203 = vmatprep.subr.bf16.mxu0 %v2202_v5  ;;  %v2218_v18 = vpack.c.bf16 %v79_v17, %v78_v16  ;;  %v81_v20 = vld [vmem:[#allocation2 + $0x68] sm:$0xff]  ;;  %v82_v22 = vld [vmem:[#allocation2 + $0x70] sm:$0xff]  ;;  %v83_v23 = vld [vmem:[#allocation2 + $0x78] sm:$0xff]  ;;  %s2447_s21 = smov 72   ;;  %s2448_s22 = smov 104   ;;  %vm1508_vm3 = vcmask 130048  }
  0x3b   :  { %v2222_v21 = vpack.c.bf16 %v81_v20, %v80_v19  ;;  %v2226_v24 = vpack.c.bf16 %v83_v23, %v82_v22  ;;  %v2548_v25 = vld [vmem:[%s2749_s0 + $0x8] sm:$0xff]  ;;  %v2563_v30 = vld [vmem:[%s2750_s1] sm:$0xff]  ;;  %s2449_s23 = smov 40   ;;  %s2450_s25 = smov 16   ;;  %vm1522_vm4 = vcmask 261120  }
  0x3c   :  { %v87_v31 = vrot.slane %v2563_v30, %v86_v29  ;;  %s2451_s2 = smov 24  }
  0x3d   :  { %2205 = vmatpush3.bf16.msra.mxu0 %v2202_v5 }
  0x3e   :  { %2207 = vmatprep.subr.bf16.mxu0 %v2206_v8 }
  0x41   :  { %2209 = vmatpush3.bf16.msra.mxu0 %v2206_v8 }
  0x42   :  { %2211 = vmatprep.subr.bf16.mxu0 %v2210_v12 }
  0x45   :  { %2213 = vmatpush3.bf16.msra.mxu0 %v2210_v12 }
  0x46   :  { %2215 = vmatprep.subr.bf16.mxu0 %v2214_v15 }
  0x49   :  { %2217 = vmatpush3.bf16.msra.mxu0 %v2214_v15 }
  0x4a   :  { %2219 = vmatprep.subr.bf16.mxu0 %v2218_v18 }
  0x4d   :  { %2221 = vmatpush3.bf16.msra.mxu0 %v2218_v18 }
  0x4e   :  { %2223 = vmatprep.subr.bf16.mxu0 %v2222_v21 }
  0x51   :  { %2225 = vmatpush3.bf16.msra.mxu0 %v2222_v21 }
  0x52   :  { %2227 = vmatprep.subr.bf16.mxu0 %v2226_v24 }
  0x55   :  { %2229 = vmatpush3.bf16.msra.mxu0 %v2226_v24 }
  0x56   :  { %2087 = vmatprep.subr.mxu0 %v2437_v26 }
  0x58   :  { %2035 = vmatmul.mubr.f32.vlgmr.msra.gmra.mrb[0].mxu0 %v2548_v25 }
  0x59   :  { %2089 = vmatprep.mubr.msk.f32.mxu0 %vm2438_vm0, %v2437_v26 }
 0x12b   :  { %v2036_v32 = vpop.f32.mrb[0].mxu0 }
 0x12c   :  { %v154_v33 = vpop.f32.mrb[1].mxu0  ;;  %v2569_v35 = vadd.f32 %v2036_v32, %v87_v31 }
 0x12d   :  { %v2566_v34 = vadd.f32 %v154_v33, %v87_v31 }
 0x12f   :  { %164 = vrot.lane.b32.xlu0 %v2566_v34, %s2439_s14 }
 0x133   :  { %242 = vrot.lane.b32.xlu0 %v2569_v35, %s2439_s14 }
 0x1a1   :  { %v165_v36 = vpop.permute.xlu0 %164 }
 0x1a2   :  { %2038 = vmatpush3.xpose.msk.msra.mxu1 %vm166_vm1, %v165_v36 }
 0x1a3   :  { %2042 = vmatprep.subr.mxu1 %v2437_v26 }
 0x1a5   :  { %2040 = vmatmul.mubr.msk.f32.vlgmr.msra.gmra.mrb[0].mxu1 %vm166_vm1, %v2566_v34  ;;  %v243_v37 = vpop.permute.xlu0 %242 }
 0x1a6   :  { %2043 = vmatpush3.xpose.msk.msra.mxu1 %vm166_vm1, %v243_v37  ;;  %2044 = vmatprep.mubr.msk.f32.mxu1 %vm2438_vm0, %v2437_v26 }
 0x1a7   :  { %2047 = vmatprep.subr.mxu1 %v2437_v26 }
 0x1a9   :  { %2045 = vmatmul.mubr.msk.f32.vlgmr.msra.gmra.mrb[2].mxu1 %vm166_vm1, %v2569_v35 }
 0x1aa   :  { %2049 = vmatprep.mubr.msk.f32.mxu1 %vm2438_vm0, %v2437_v26 }
 0x278   :  { %v237_v38 = vpop.f32.mrb[0].mxu1 }
 0x279   :  { %v2041_v39 = vpop.f32.mrb[1].mxu1  ;;  %v318_v40 = vsel %vm166_vm1, %v237_v38, -inf }
 0x27a   :  { %319 = vmax.xlane.f32.xlu1 %v318_v40 }
 0x27c   :  { %v314_v41 = vpop.f32.mrb[2].mxu1 }
 0x27d   :  { %v2046_v42 = vpop.f32.mrb[3].mxu1  ;;  %v321_v43 = vsel %vm166_vm1, %v314_v41, -inf }
 0x27e   :  { %322 = vmax.xlane.f32.xlu1 %v321_v43 }
 0x28f   :  { %340 = vrot.lane.b32.xlu1 %v2566_v34, %s2440_s15 }
 0x293   :  { %416 = vrot.lane.b32.xlu1 %v2569_v35, %s2440_s15 }
 0x297   :  { %494 = vrot.lane.b32.xlu1 %v2566_v34, %s2441_s16 }
 0x307   :  { %v320_v44 = vpop.xlane.xlu1 %319 }
 0x308   :  { %v324_v45 = vsub.f32 %v237_v38, %v320_v44 }
 0x30a   :  { %v326_v46 = vmul.f32 1.442695, %v324_v45 }
 0x30b   :  { %v323_v47 = vpop.xlane.xlu1 %322 }
 0x30c   :  { %2322 = vpow2.f32 %v326_v46  ;;  %v325_v48 = vsub.f32 %v314_v41, %v323_v47 }
 0x30e   :  { %v328_v49 = vmul.f32 1.442695, %v325_v48 }
 0x30f   :  { %v341_v50 = vpop.permute.xlu1 %340 }
 0x310   :  { %2324 = vpow2.f32 %v328_v49  ;;  %2048 = vmatpush3.msra.mxu1 %v341_v50 }
 0x311   :  { %2052 = vmatprep.subr.mxu1 %v2437_v26 }
 0x313   :  { %v417_v55 = vpop.permute.xlu1 %416 }
 0x316   :  { %v2323_v51 = vpop.eup %2322 }
 0x317   :  { %v330_v52 = vsel %vm166_vm1, %v2323_v51, 0.0  ;;  %v495_v56 = vpop.permute.xlu1 %494 }
 0x318   :  { %331 = vadd.xlane.f32.xlu0 %v330_v52 }
 0x31a   :  { %v2325_v53 = vpop.eup %2324 }
 0x31b   :  { %v333_v54 = vsel %vm166_vm1, %v2325_v53, 0.0 }
 0x31c   :  { %334 = vadd.xlane.f32.xlu1 %v333_v54 }
 0x32d   :  { %492 = vrot.lane.b32.xlu1 %v2566_v34, %s2442_s17 }
 0x32e   :  { %572 = vrot.lane.b32.xlu0 %v2569_v35, %s2441_s16 }
 0x331   :  { %570 = vrot.lane.b32.xlu1 %v2569_v35, %s2442_s17 }
 0x3a5   :  { %v332_v57 = vpop.xlane.xlu0 %331 }
 0x3a6   :  { %2326 = vrcp.f32 %v332_v57 }
 0x3a9   :  { %v335_v58 = vpop.xlane.xlu1 %334  ;;  %v573_v0 = vpop.permute.xlu0 %572 }
 0x3aa   :  { %2328 = vrcp.f32 %v335_v58 }
 0x3ad   :  { %v493_v63 = vpop.permute.xlu1 %492 }
 0x3b0   :  { %v2327_v59 = vpop.eup %2326 }
 0x3b1   :  { %v337_v60 = vmul.f32 %v2327_v59, %v2323_v51  ;;  %v571_v1 = vpop.permute.xlu1 %570 }
 0x3b3   :  { %2050 = vmatmul.mubr.msk.f32.vlgmr.msra.gmra.mrb[4].mxu1 %vm166_vm1, %v337_v60 }
 0x3b4   :  { %v2329_v61 = vpop.eup %2328  ;;  %2053 = vmatpush3.msra.mxu1 %v417_v55  ;;  %2054 = vmatprep.mubr.msk.f32.mxu1 %vm2438_vm0, %v2437_v26 }
 0x3b5   :  { %v339_v62 = vmul.f32 %v2329_v61, %v2325_v53  ;;  %2057 = vmatprep.subr.mxu1 %v2437_v26 }
 0x3b7   :  { %2055 = vmatmul.mubr.msk.f32.vlgmr.msra.gmra.mrb[6].mxu1 %vm166_vm1, %v339_v62 }
 0x3b8   :  { %2059 = vmatprep.mubr.msk.f32.mxu1 %vm2438_vm0, %v2437_v26 }
 0x3bb   :  { %2058 = vmatpush3.xpose.msk.msra.mxu1 %vm166_vm1, %v495_v56 }
 0x3bc   :  { %2062 = vmatprep.subr.mxu1 %v2437_v26 }
 0x3be   :  { %2060 = vmatmul.mubr.msk.f32.vlgmr.msra.gmra.mrb[8].mxu1 %vm166_vm1, %v493_v63 }
 0x3bf   :  { %2063 = vmatpush3.xpose.msk.msra.mxu1 %vm166_vm1, %v573_v0  ;;  %2064 = vmatprep.mubr.msk.f32.mxu1 %vm2438_vm0, %v2437_v26 }
 0x3c0   :  { %2067 = vmatprep.subr.mxu1 %v2437_v26 }
 0x3c2   :  { %2065 = vmatmul.mubr.msk.f32.vlgmr.msra.gmra.mrb[10].mxu1 %vm166_vm1, %v571_v1 }
 0x3c3   :  { %2069 = vmatprep.mubr.msk.f32.mxu1 %vm2438_vm0, %v2437_v26 }
 0x486   :  { %v2612_v2 = vpop.f32.mrb[4].mxu1 }
 0x487   :  { %v2051_v3 = vpop.f32.mrb[5].mxu1 }
 0x48a   :  { %v2614_v4 = vpop.f32.mrb[6].mxu1 }
 0x48b   :  { %v2056_v5 = vpop.f32.mrb[7].mxu1 }
 0x491   :  { %v566_v6 = vpop.f32.mrb[8].mxu1 }
 0x492   :  { %v2061_v7 = vpop.f32.mrb[9].mxu1  ;;  %v648_v8 = vsel %vm166_vm1, %v566_v6, -inf }
 0x493   :  { %649 = vmax.xlane.f32.xlu1 %v648_v8 }
 0x495   :  { %v644_v10 = vpop.f32.mrb[10].mxu1 }
 0x496   :  { %v2066_v11 = vpop.f32.mrb[11].mxu1  ;;  %v651_v12 = vsel %vm166_vm1, %v644_v10, -inf }
 0x497   :  { %652 = vmax.xlane.f32.xlu0 %v651_v12 }
 0x4a4   :  { %670 = vrot.lane.b32.xlu1 %v2566_v34, %s2443_s18 }
 0x4a8   :  { %824 = vrot.lane.b32.xlu1 %v2566_v34, %s2444_s19 }
 0x4ad   :  { %746 = vrot.lane.b32.xlu0 %v2569_v35, %s2443_s18 }
 0x4b1   :  { %902 = vrot.lane.b32.xlu0 %v2569_v35, %s2444_s19 }
 0x520   :  { %v650_v13 = vpop.xlane.xlu1 %649 }
 0x521   :  { %v654_v14 = vsub.f32 %v566_v6, %v650_v13 }
 0x523   :  { %v656_v15 = vmul.f32 1.442695, %v654_v14 }
 0x524   :  { %v671_v16 = vpop.permute.xlu1 %670  ;;  %v653_v19 = vpop.xlane.xlu0 %652 }
 0x525   :  { %2330 = vpow2.f32 %v656_v15  ;;  %2068 = vmatpush3.msra.mxu1 %v671_v16  ;;  %v655_v20 = vsub.f32 %v644_v10, %v653_v19 }
 0x526   :  { %2072 = vmatprep.subr.mxu1 %v2437_v26 }
 0x527   :  { %v658_v21 = vmul.f32 1.442695, %v655_v20 }
 0x528   :  { %v825_v24 = vpop.permute.xlu1 %824  ;;  %v747_v32 = vpop.permute.xlu0 %746 }
 0x529   :  { %2332 = vpow2.f32 %v658_v21 }
 0x52c   :  { %v903_v39 = vpop.permute.xlu0 %902 }
 0x52f   :  { %v2331_v17 = vpop.eup %2330 }
 0x530   :  { %v660_v18 = vsel %vm166_vm1, %v2331_v17, 0.0 }
 0x531   :  { %661 = vadd.xlane.f32.xlu1 %v660_v18 }
 0x533   :  { %v2333_v22 = vpop.eup %2332 }
 0x534   :  { %v663_v23 = vsel %vm166_vm1, %v2333_v22, 0.0 }
 0x542   :  { %822 = vrot.lane.b32.xlu1 %v2566_v34, %s2445_s20 }
 0x566   :  { %664 = vadd.xlane.f32.xlu1 %v663_v23 }
 0x577   :  { %900 = vrot.lane.b32.xlu1 %v2569_v35, %s2445_s20 }
 0x5be   :  { %v662_v27 = vpop.xlane.xlu1 %661 }
 0x5bf   :  { %2334 = vrcp.f32 %v662_v27 }
 0x5c2   :  { %v823_v33 = vpop.permute.xlu1 %822 }
 0x5c9   :  { %v2335_v29 = vpop.eup %2334 }
 0x5ca   :  { %v667_v31 = vmul.f32 %v2335_v29, %v2331_v17 }
 0x5cc   :  { %2070 = vmatmul.mubr.msk.f32.vlgmr.msra.gmra.mrb[12].mxu1 %vm166_vm1, %v667_v31 }
 0x5cd   :  { %2073 = vmatpush3.msra.mxu1 %v747_v32  ;;  %2074 = vmatprep.mubr.msk.f32.mxu1 %vm2438_vm0, %v2437_v26 }
 0x5ce   :  { %2077 = vmatprep.subr.mxu1 %v2437_v26 }
 0x5f3   :  { %v665_v36 = vpop.xlane.xlu1 %664 }
 0x5f4   :  { %2336 = vrcp.f32 %v665_v36 }
 0x5f7   :  { %v901_v40 = vpop.permute.xlu1 %900 }
 0x5fe   :  { %v2337_v37 = vpop.eup %2336 }
 0x5ff   :  { %v669_v38 = vmul.f32 %v2337_v37, %v2333_v22 }
 0x601   :  { %2075 = vmatmul.mubr.msk.f32.vlgmr.msra.gmra.mrb[14].mxu1 %vm166_vm1, %v669_v38 }
 0x602   :  { %2078 = vmatpush3.xpose.msk.msra.mxu1 %vm166_vm1, %v825_v24  ;;  %2079 = vmatprep.mubr.msk.f32.mxu1 %vm2438_vm0, %v2437_v26 }
 0x603   :  { %2082 = vmatprep.subr.mxu1 %v2437_v26 }
 0x605   :  { %2080 = vmatmul.mubr.msk.f32.vlgmr.msra.gmra.mrb[16].mxu1 %vm166_vm1, %v823_v33 }
 0x606   :  { %2083 = vmatpush3.xpose.msk.msra.mxu1 %vm166_vm1, %v903_v39  ;;  %2084 = vmatprep.mubr.msk.f32.mxu1 %vm2438_vm0, %v2437_v26 }
 0x607   :  { %2092 = vmatprep.subr.mxu1 %v2437_v26 }
 0x609   :  { %2085 = vmatmul.mubr.msk.f32.vlgmr.msra.gmra.mrb[18].mxu1 %vm166_vm1, %v901_v40 }
 0x60a   :  { %2094 = vmatprep.mubr.msk.f32.mxu1 %vm2438_vm0, %v2437_v26 }
 0x69f   :  { %v2644_v41 = vpop.f32.mrb[12].mxu1 }
 0x6a0   :  { %v2071_v42 = vpop.f32.mrb[13].mxu1 }
 0x6d4   :  { %v2646_v43 = vpop.f32.mrb[14].mxu1 }
 0x6d5   :  { %v2076_v44 = vpop.f32.mrb[15].mxu1 }
 0x6d6   :  { %v1514_v44 = vld [vmem:[%s2752_s3] sm:$0xff] }
 0x6d8   :  { %v896_v45 = vpop.f32.mrb[16].mxu1 }
 0x6d9   :  { %v2081_v46 = vpop.f32.mrb[17].mxu1  ;;  %v978_v47 = vsel %vm166_vm1, %v896_v45, -inf }
 0x6da   :  { %979 = vmax.xlane.f32.xlu0 %v978_v47  ;;  %v1516_v46 = vld [vmem:[%s2752_s3 + $0x10] sm:$0xff]  ;;  %v1517_v47 = vld [vmem:[%s2752_s3 + $0x18] sm:$0xff] }
 0x6dc   :  { %v974_v48 = vpop.f32.mrb[18].mxu1 }
 0x6dd   :  { %v2086_v49 = vpop.f32.mrb[19].mxu1  ;;  %v981_v50 = vsel %vm166_vm1, %v974_v48, -inf }
 0x6de   :  { %982 = vmax.xlane.f32.xlu1 %v981_v50 }
 0x6ef   :  { %1000 = vrot.lane.b32.xlu1 %v2566_v34, %s2446_s4 }
 0x6f0   :  { %1076 = vrot.lane.b32.xlu0 %v2569_v35, %s2446_s4 }
 0x6f3   :  { %1154 = vrot.lane.b32.xlu1 %v2566_v34, %s2447_s21 }
 0x6f7   :  { %1232 = vrot.lane.b32.xlu1 %v2569_v35, %s2447_s21 }
 0x6fb   :  { %1230 = vrot.lane.b32.xlu1 %v2569_v35, %s2448_s22 }
 0x767   :  { %v980_v51 = vpop.xlane.xlu0 %979 }
 0x768   :  { %v984_v52 = vsub.f32 %v896_v45, %v980_v51 }
 0x76a   :  { %v986_v53 = vmul.f32 1.442695, %v984_v52 }
 0x76b   :  { %v1077_v54 = vpop.permute.xlu0 %1076  ;;  %v983_v55 = vpop.xlane.xlu1 %982 }
 0x76c   :  { %2338 = vpow2.f32 %v986_v53  ;;  %v985_v56 = vsub.f32 %v974_v48, %v983_v55  ;;  %2093 = vmatpush3.msra.mxu1 %v1077_v54  ;;  %v2234_v48 = vpack.c.bf16 %v1517_v47, %v1516_v46  ;;  %v1743_v47 = vld [vmem:[#allocation6] sm:$0xff] }
 0x76d   :  { %2102 = vmatprep.subr.mxu1 %v2437_v26 }
 0x76e   :  { %v988_v57 = vmul.f32 1.442695, %v985_v56 }
 0x76f   :  { %v1001_v58 = vpop.permute.xlu1 %1000 }
 0x770   :  { %2340 = vpow2.f32 %v988_v57  ;;  %2088 = vmatpush3.msra.mxu0 %v1001_v58 }
 0x771   :  { %2097 = vmatprep.subr.mxu0 %v2437_v26 }
 0x773   :  { %v1155_v1 = vpop.permute.xlu1 %1154 }
 0x776   :  { %v2339_v59 = vpop.eup %2338 }
 0x777   :  { %v990_v60 = vsel %vm166_vm1, %v2339_v59, 0.0  ;;  %v1233_v7 = vpop.permute.xlu1 %1232 }
 0x778   :  { %991 = vadd.xlane.f32.xlu0 %v990_v60 }
 0x77a   :  { %v2341_v61 = vpop.eup %2340 }
 0x77b   :  { %v993_v62 = vsel %vm166_vm1, %v2341_v61, 0.0  ;;  %v1231_v11 = vpop.permute.xlu1 %1230 }
 0x77c   :  { %994 = vadd.xlane.f32.xlu0 %v993_v62 }
 0x792   :  { %1152 = vrot.lane.b32.xlu0 %v2566_v34, %s2448_s22 }
 0x805   :  { %v992_v63 = vpop.xlane.xlu0 %991 }
 0x806   :  { %2342 = vrcp.f32 %v992_v63 }
 0x809   :  { %v995_v0 = vpop.xlane.xlu0 %994 }
 0x80a   :  { %2344 = vrcp.f32 %v995_v0 }
 0x80d   :  { %v1153_v10 = vpop.permute.xlu0 %1152 }
 0x810   :  { %v2343_v3 = vpop.eup %2342 }
 0x811   :  { %v997_v5 = vmul.f32 %v2343_v3, %v2339_v59 }
 0x813   :  { %2090 = vmatmul.mubr.msk.f32.vlgmr.msra.gmra.mrb[2].mxu0 %vm166_vm1, %v997_v5 }
 0x814   :  { %v2345_v6 = vpop.eup %2344  ;;  %2098 = vmatpush3.xpose.msk.msra.mxu0 %vm166_vm1, %v1155_v1  ;;  %2099 = vmatprep.mubr.msk.f32.mxu0 %vm2438_vm0, %v2437_v26  ;;  %v1520_v1 = vsub.s32 2, %v2553_v28 }
 0x815   :  { %v999_v8 = vmul.f32 %v2345_v6, %v2341_v61  ;;  %2107 = vmatprep.subr.mxu0 %v2437_v26 }
 0x816   :  { %v1521_v3 = vrot.slane %v2563_v30, %v1520_v1  ;;  %v1755_v1 = vld [vmem:[#allocation6 + $0x60] sm:$0xff] }
 0x817   :  { %2095 = vmatmul.mubr.msk.f32.vlgmr.msra.gmra.mrb[20].mxu1 %vm166_vm1, %v999_v8  ;;  %2100 = vmatmul.mubr.msk.f32.vlgmr.msra.gmra.mrb[4].mxu0 %vm166_vm1, %v1153_v10 }
 0x818   :  { %2103 = vmatpush3.xpose.msk.msra.mxu1 %vm166_vm1, %v1233_v7  ;;  %2104 = vmatprep.mubr.msk.f32.mxu1 %vm2438_vm0, %v2437_v26 }
 0x819   :  { %2112 = vmatprep.subr.mxu1 %v2437_v26  ;;  %2109 = vmatprep.mubr.msk.f32.mxu0 %vm2438_vm0, %v2437_v26 }
 0x81b   :  { %2105 = vmatmul.mubr.msk.f32.vlgmr.msra.gmra.mrb[22].mxu1 %vm166_vm1, %v1231_v11  ;;  %v1646_v11 = vld [vmem:[#allocation4] sm:$0xff] }
 0x81c   :  { %2114 = vmatprep.mubr.msk.f32.mxu1 %vm2438_vm0, %v2437_v26 }
 0x8e6   :  { %v1072_v12 = vpop.f32.mrb[2].mxu0 }
 0x8e7   :  { %v2091_v13 = vpop.f32.mrb[3].mxu0 }
 0x8ea   :  { %v1148_v14 = vpop.f32.mrb[20].mxu1  ;;  %v1226_v15 = vpop.f32.mrb[4].mxu0 }
 0x8eb   :  { %v2096_v16 = vpop.f32.mrb[21].mxu1  ;;  %v2101_v17 = vpop.f32.mrb[5].mxu0  ;;  %v1308_v18 = vsel %vm166_vm1, %v1226_v15, -inf }
 0x8ec   :  { %1309 = vmax.xlane.f32.xlu0 %v1308_v18  ;;  %v1616_v16 = vsub.s32 0, %v2553_v28 }
 0x8ee   :  { %v1304_v19 = vpop.f32.mrb[22].mxu1 }
 0x8ef   :  { %v2106_v20 = vpop.f32.mrb[23].mxu1  ;;  %v1311_v21 = vsel %vm166_vm1, %v1304_v19, -inf }
 0x8f0   :  { %1312 = vmax.xlane.f32.xlu1 %v1311_v21 }
 0x901   :  { %1330 = vrot.lane.b32.xlu1 %v2566_v34, %s2449_s23 }
 0x905   :  { %1484 = vrot.lane.b32.xlu1 %v2644_v41, %s2435_s10 }
 0x909   :  { %1486 = vrot.lane.b32.xlu1 %v2646_v43, %s2435_s10 }
 0x90d   :  { %1494 = vrot.lane.b32.xlu1 %v1148_v14, %s2450_s25  ;;  %v1649_v14 = vld [vmem:[#allocation4 + $0x18] sm:$0xff] }
 0x979   :  { %v1310_v26 = vpop.xlane.xlu0 %1309 }
 0x97a   :  { %v1314_v22 = vsub.f32 %v1226_v15, %v1310_v26 }
 0x97c   :  { %v1316_v23 = vmul.f32 1.442695, %v1314_v22 }
 0x97d   :  { %v1313_v24 = vpop.xlane.xlu1 %1312 }
 0x97e   :  { %2346 = vpow2.f32 %v1316_v23  ;;  %v1315_v27 = vsub.f32 %v1304_v19, %v1313_v24 }
 0x980   :  { %v1318_v29 = vmul.f32 1.442695, %v1315_v27  ;;  %v1650_v27 = vld [vmem:[#allocation4 + $0x20] sm:$0xff] }
 0x981   :  { %v1331_v31 = vpop.permute.xlu1 %1330 }
 0x982   :  { %2348 = vpow2.f32 %v1318_v29  ;;  %2108 = vmatpush3.msra.mxu0 %v1331_v31  ;;  %v1651_v29 = vld [vmem:[#allocation4 + $0x28] sm:$0xff] }
 0x983   :  { %v2246_v31 = vpack.c.bf16 %v1651_v29, %v1650_v27  ;;  %v1758_v27 = vld [vmem:[#allocation6 + $0x78] sm:$0xff] }
 0x985   :  { %v1485_v53 = vpop.permute.xlu1 %1484 }
 0x986   :  { %v1506_v56 = vsel %vm166_vm1, %v2612_v2, %v1485_v53  ;;  %v1747_v53 = vld [vmem:[#allocation6 + $0x20] sm:$0xff] }
 0x988   :  { %v2347_v32 = vpop.eup %2346 }
 0x989   :  { %v1320_v34 = vsel %vm166_vm1, %v2347_v32, 0.0  ;;  %v1487_v54 = vpop.permute.xlu1 %1486 }
 0x98a   :  { %1321 = vadd.xlane.f32.xlu0 %v1320_v34  ;;  %v1507_v61 = vsel %vm166_vm1, %v2614_v4, %v1487_v54  ;;  %v1647_v4 = vld [vmem:[#allocation4 + $0x8] sm:$0xff]  ;;  %v1653_v34 = vld [vmem:[#allocation4 + $0x38] sm:$0xff] }
 0x98b   :  { %v2238_v13 = vpack.c.bf16 %v1647_v4, %v1646_v11  ;;  %v1748_v54 = vld [vmem:[#allocation6 + $0x28] sm:$0xff]  ;;  %v1636_v4 = vsub.s32 3, %v2553_v28 }
 0x98c   :  { %v2349_v33 = vpop.eup %2348 }
 0x98d   :  { %v1323_v36 = vsel %vm166_vm1, %v2349_v33, 0.0  ;;  %v1495_v57 = vpop.permute.xlu1 %1494 }
 0x98e   :  { %1324 = vadd.xlane.f32.xlu0 %v1323_v36  ;;  %v1510_v62 = vsel %vm1508_vm3, %v1507_v61, %v1495_v57  ;;  %v1654_v36 = vld [vmem:[#allocation4 + $0x40] sm:$0xff]  ;;  %v1750_v57 = vld [vmem:[#allocation6 + $0x38] sm:$0xff] }
 0x9a4   :  { %1406 = vrot.lane.b32.xlu0 %v2569_v35, %s2449_s23  ;;  %v1515_v35 = vld [vmem:[%s2752_s3 + $0x8] sm:$0xff] }
 0x9a5   :  { %v2230_v45 = vpack.c.bf16 %v1515_v35, %v1514_v44  ;;  %v1660_v35 = vld [vmem:[#allocation4 + $0x70] sm:$0xff] }
 0x9a7   :  { %2231 = vmatprep.subr.bf16.mxu0 %v2230_v45 }
 0x9a8   :  { %1492 = vrot.lane.b32.xlu0 %v1072_v12, %s2450_s25  ;;  %v1648_v12 = vld [vmem:[#allocation4 + $0x10] sm:$0xff] }
 0x9a9   :  { %v2242_v15 = vpack.c.bf16 %v1649_v14, %v1648_v12  ;;  %v1642_v12 = vsub.s32 4, %v2553_v28 }
 0xa17   :  { %v1322_v37 = vpop.xlane.xlu0 %1321 }
 0xa18   :  { %2350 = vrcp.f32 %v1322_v37  ;;  %v1655_v37 = vld [vmem:[#allocation4 + $0x48] sm:$0xff] }
 0xa1b   :  { %v1325_v38 = vpop.xlane.xlu0 %1324 }
 0xa1c   :  { %2352 = vrcp.f32 %v1325_v38  ;;  %v2254_v38 = vpack.c.bf16 %v1655_v37, %v1654_v36 }
 0xa1f   :  { %v1407_v39 = vpop.permute.xlu0 %1406 }
 0xa20   :  { %2113 = vmatpush3.msra.mxu1 %v1407_v39  ;;  %v1656_v39 = vld [vmem:[#allocation4 + $0x50] sm:$0xff] }
 0xa21   :  { %2239 = vmatprep.subr.bf16.mxu1 %v2238_v13 }
 0xa22   :  { %v2351_v40 = vpop.eup %2350 }
 0xa23   :  { %v1327_v41 = vmul.f32 %v2351_v40, %v2347_v32  ;;  %v1493_v55 = vpop.permute.xlu0 %1492  ;;  %v1652_v32 = vld [vmem:[#allocation4 + $0x30] sm:$0xff]  ;;  %v1657_v40 = vld [vmem:[#allocation4 + $0x58] sm:$0xff] }
 0xa24   :  { %v1509_v58 = vsel %vm1508_vm3, %v1506_v56, %v1493_v55  ;;  %v2278_v55 = vpack.c.bf16 %v1748_v54, %v1747_v53  ;;  %v1749_v56 = vld [vmem:[#allocation6 + $0x30] sm:$0xff] }
 0xa25   :  { %2110 = vmatmul.mubr.msk.f32.vlgmr.msra.gmra.mrb[6].mxu0 %vm166_vm1, %v1327_v41  ;;  %v2258_v41 = vpack.c.bf16 %v1657_v40, %v1656_v39 }
 0xa26   :  { %v2353_v42 = vpop.eup %2352  ;;  %2233 = vmatpush3.bf16.msra.mxu0 %v2230_v45  ;;  %v1661_v45 = vld [vmem:[#allocation4 + $0x78] sm:$0xff] }
 0xa27   :  { %v1329_v43 = vmul.f32 %v2353_v42, %v2349_v33  ;;  %2235 = vmatprep.subr.bf16.mxu0 %v2234_v48  ;;  %v2250_v33 = vpack.c.bf16 %v1653_v34, %v1652_v32  ;;  %v1658_v42 = vld [vmem:[#allocation4 + $0x60] sm:$0xff]  ;;  %v2266_v46 = vpack.c.bf16 %v1661_v45, %v1660_v35 }
 0xa29   :  { %2115 = vmatmul.mubr.msk.f32.vlgmr.msra.gmra.mrb[24].mxu1 %vm166_vm1, %v1329_v43  ;;  %v1659_v43 = vld [vmem:[#allocation4 + $0x68] sm:$0xff] }
 0xa2a   :  { %2237 = vmatpush3.bf16.msra.mxu0 %v2234_v48  ;;  %2241 = vmatpush3.bf16.msra.mxu1 %v2238_v13  ;;  %v2262_v44 = vpack.c.bf16 %v1659_v43, %v1658_v42  ;;  %v1744_v48 = vld [vmem:[#allocation6 + $0x8] sm:$0xff]  ;;  %v1637_v13 = vrot.slane %v2563_v30, %v1636_v4 }
 0xa2b   :  { %2243 = vmatprep.subr.bf16.mxu1 %v2242_v15 }
 0xa2e   :  { %2245 = vmatpush3.bf16.msra.mxu1 %v2242_v15 }
 0xa2f   :  { %2247 = vmatprep.subr.bf16.mxu1 %v2246_v31 }
 0xa32   :  { %2249 = vmatpush3.bf16.msra.mxu1 %v2246_v31  ;;  %v1664_v31 = vsub.s32 5, %v2553_v28 }
 0xa33   :  { %2251 = vmatprep.subr.bf16.mxu1 %v2250_v33 }
 0xa36   :  { %2253 = vmatpush3.bf16.msra.mxu1 %v2250_v33 }
 0xa37   :  { %2255 = vmatprep.subr.bf16.mxu1 %v2254_v38 }
 0xa3a   :  { %2257 = vmatpush3.bf16.msra.mxu1 %v2254_v38 }
 0xa3b   :  { %2259 = vmatprep.subr.bf16.mxu1 %v2258_v41 }
 0xa3e   :  { %2261 = vmatpush3.bf16.msra.mxu1 %v2258_v41 }
 0xa3f   :  { %2263 = vmatprep.subr.bf16.mxu1 %v2262_v44 }
 0xa42   :  { %2265 = vmatpush3.bf16.msra.mxu1 %v2262_v44 }
 0xa43   :  { %2267 = vmatprep.subr.bf16.mxu1 %v2266_v46 }
 0xa46   :  { %2269 = vmatpush3.bf16.msra.mxu1 %v2266_v46 }
 0xaf8   :  { %v1402_v49 = vpop.f32.mrb[6].mxu0 }
 0xaf9   :  { %1500 = vrot.lane.b32.xlu0 %v1402_v49, %s2451_s2  ;;  %v2111_v50 = vpop.f32.mrb[7].mxu0  ;;  %v1745_v49 = vld [vmem:[#allocation6 + $0x10] sm:$0xff] }
 0xafa   :  { %v2270_v50 = vpack.c.bf16 %v1744_v48, %v1743_v47 }
 0xafc   :  { %v1478_v51 = vpop.f32.mrb[24].mxu1  ;;  %2271 = vmatprep.subr.bf16.mxu0 %v2270_v50 }
 0xafd   :  { %1502 = vrot.lane.b32.xlu1 %v1478_v51, %s2451_s2  ;;  %v2116_v52 = vpop.f32.mrb[25].mxu1  ;;  %v1746_v51 = vld [vmem:[#allocation6 + $0x18] sm:$0xff] }
 0xafe   :  { %v2274_v52 = vpack.c.bf16 %v1746_v51, %v1745_v49 }
 0xb6b   :  { %v1501_v59 = vpop.permute.xlu0 %1500 }
 0xb6c   :  { %v1512_v60 = vsel %vm1511_vm2, %v1509_v58, %v1501_v59  ;;  %v2282_v58 = vpack.c.bf16 %v1750_v57, %v1749_v56  ;;  %v1751_v59 = vld [vmem:[#allocation6 + $0x40] sm:$0xff] }
 0xb6d   :  { %2125 = vmatprep.mubr.msk.f32.mxu0 %vm1522_vm4, %v1512_v60  ;;  %v1752_v60 = vld [vmem:[#allocation6 + $0x48] sm:$0xff] }
 0xb6e   :  { %v2286_v61 = vpack.c.bf16 %v1752_v60, %v1751_v59 }
 0xb6f   :  { %v1503_v63 = vpop.permute.xlu1 %1502 }
 0xb70   :  { %v1513_v0 = vsel %vm1511_vm2, %v1510_v62, %v1503_v63  ;;  %v1753_v62 = vld [vmem:[#allocation6 + $0x50] sm:$0xff]  ;;  %v1754_v63 = vld [vmem:[#allocation6 + $0x58] sm:$0xff] }
 0xb71   :  { %2126 = vmatmul.mubr.msk.f32.vlgmr.msra.gmra.mrb[8].mxu0 %vm1522_vm4, %v1513_v0  ;;  %v2290_v0 = vpack.c.bf16 %v1754_v63, %v1753_v62  ;;  %v67_v62 = vld [vmem:[%s2750_s1 + $0x8] sm:$0xff] }
 0xb72   :  { %2273 = vmatpush3.bf16.msra.mxu0 %v2270_v50 }
 0xb73   :  { %2275 = vmatprep.subr.bf16.mxu0 %v2274_v52 }
 0xb76   :  { %2277 = vmatpush3.bf16.msra.mxu0 %v2274_v52 }
 0xb77   :  { %2279 = vmatprep.subr.bf16.mxu0 %v2278_v55 }
 0xb7a   :  { %2281 = vmatpush3.bf16.msra.mxu0 %v2278_v55 }
 0xb7b   :  { %2283 = vmatprep.subr.bf16.mxu0 %v2282_v58 }
 0xb7e   :  { %2285 = vmatpush3.bf16.msra.mxu0 %v2282_v58 }
 0xb7f   :  { %2287 = vmatprep.subr.bf16.mxu0 %v2286_v61 }
 0xb82   :  { %2289 = vmatpush3.bf16.msra.mxu0 %v2286_v61  ;;  %v1866_v61 = vsub.s32 7, %v2553_v28 }
 0xb83   :  { %2291 = vmatprep.subr.bf16.mxu0 %v2290_v0 }
 0xb86   :  { %2293 = vmatpush3.bf16.msra.mxu0 %v2290_v0 }
 0xc44   :  { %v2127_v5 = vpop.f32.mrb[8].mxu0 }
 0xc45   :  { %v1601_v2 = vadd.f32 %v2127_v5, %v1521_v3  ;;  %v1595_v6 = vpop.f32.mrb[9].mxu0 }
 0xc46   :  { %v1596_v7 = vadd.f32 %v1595_v6, %v1521_v3  ;;  %v1756_v3 = vld [vmem:[#allocation6 + $0x68] sm:$0xff] }
 0xc47   :  { %v1605_v8 = vadd.f32 %v1601_v2, %v2548_v25  ;;  %v2294_v5 = vpack.c.bf16 %v1756_v3, %v1755_v1  ;;  %v1873_v1 = vrot.slane %v67_v62, %v1616_v16 }
 0xc48   :  { %v1604_v10 = vadd.f32 %v1596_v7, %v2542_v9  ;;  %v2712_v9 = vrot.slane %v2563_v30, %v1616_v16 }
 0xc49   :  { %1608 = vadd.xlane.f32.xlu1 %v1605_v8  ;;  %2295 = vmatprep.subr.bf16.mxu0 %v2294_v5 }
 0xc4a   :  { %1606 = vadd.xlane.f32.xlu0 %v1604_v10  ;;  %2297 = vmatpush3.bf16.msra.mxu0 %v2294_v5 }
 0xcd6   :  { %v1609_v17 = vpop.xlane.xlu1 %1608 }
 0xcd7   :  { %v1611_v18 = vmul.f32 0.03125, %v1609_v17  ;;  %v1607_v19 = vpop.xlane.xlu0 %1606  ;;  %v1643_v17 = vrot.slane %v2563_v30, %v1642_v12 }
 0xcd8   :  { %v1610_v25 = vmul.f32 0.03125, %v1607_v19 }
 0xcd9   :  { %v1613_v20 = vsub.f32 %v1605_v8, %v1611_v18 }
 0xcda   :  { %v1612_v21 = vsub.f32 %v1604_v10, %v1610_v25 }
 0xcdb   :  { %v2720_v23 = vmul.f32 %v2712_v9, %v1613_v20 }
 0xcdc   :  { %v2715_v26 = vmul.f32 %v2712_v9, %v1612_v21 }
 0xcdd   :  { %v1621_v24 = vmul.f32 %v2720_v23, %v2720_v23 }
 0xcde   :  { %v1620_v22 = vmul.f32 %v2715_v26, %v2715_v26 }
 0xce0   :  { %1622 = vadd.xlane.f32.xlu0 %v1620_v22 }
 0xce4   :  { %1624 = vadd.xlane.f32.xlu0 %v1621_v24  ;;  %v1757_v24 = vld [vmem:[#allocation6 + $0x70] sm:$0xff] }
 0xce5   :  { %v2298_v29 = vpack.c.bf16 %v1758_v27, %v1757_v24 }
 0xce7   :  { %2299 = vmatprep.subr.bf16.mxu0 %v2298_v29 }
 0xce8   :  { %2301 = vmatpush3.bf16.msra.mxu0 %v2298_v29 }
 0xd6d   :  { %v1623_v2 = vpop.xlane.xlu0 %1622 }
 0xd6e   :  { %v1626_v6 = vmul.f32 0.03125, %v1623_v2 }
 0xd70   :  { %v1628_v7 = vadd.f32 1e-05, %v1626_v6 }
 0xd71   :  { %v1625_v8 = vpop.xlane.xlu0 %1624 }
 0xd72   :  { %2354 = vrsqrt.f32 %v1628_v7  ;;  %v1627_v10 = vmul.f32 0.03125, %v1625_v8 }
 0xd74   :  { %v1629_v11 = vadd.f32 1e-05, %v1627_v10 }
 0xd76   :  { %2356 = vrsqrt.f32 %v1629_v11 }
 0xd7c   :  { %v2355_v14 = vpop.eup %2354 }
 0xd7d   :  { %v1632_v15 = vmul.f32 %v2355_v14, %v2715_v26  ;;  %v1665_v26 = vrot.slane %v2563_v30, %v1664_v31 }
 0xd7f   :  { %v1638_v18 = vmul.f32 %v1637_v13, %v1632_v15 }
 0xd80   :  { %v2357_v19 = vpop.eup %2356 }
 0xd81   :  { %v1644_v25 = vadd.f32 %v1643_v17, %v1638_v18  ;;  %v1633_v20 = vmul.f32 %v2357_v19, %v2720_v23  ;;  %v1761_v23 = vsub.s32 6, %v2553_v28 }
 0xd83   :  { %2160 = vmatprep.mubr.f32.mxu1 %v1644_v25  ;;  %v1639_v21 = vmul.f32 %v1637_v13, %v1633_v20  ;;  %v1762_v39 = vrot.slane %v2563_v30, %v1761_v23 }
 0xd85   :  { %v1645_v22 = vadd.f32 %v1643_v17, %v1639_v21 }
 0xd87   :  { %2161 = vmatmul.mubr.f32.vlgmr.msra.gmra.mrb[26].mxu1 %v1645_v22 }
 0xe5a   :  { %v2162_v32 = vpop.f32.mrb[26].mxu1 }
 0xe5b   :  { %v1738_v34 = vadd.f32 %v2162_v32, %v1665_v26  ;;  %v1732_v33 = vpop.f32.mrb[27].mxu1 }
 0xe5c   :  { %v1733_v36 = vadd.f32 %v1732_v33, %v1665_v26 }
 0xe5d   :  { %v1742_v38 = vmax.f32 %v1738_v34, 0.0 }
 0xe5e   :  { %v1741_v37 = vmax.f32 %v1733_v36, 0.0 }
 0xe60   :  { %2195 = vmatprep.mubr.f32.mxu0 %v1741_v37 }
 0xe61   :  { %2196 = vmatmul.mubr.f32.vlgmr.msra.gmra.mrb[10].mxu0 %v1742_v38 }
 0xf34   :  { %v2197_v40 = vpop.f32.mrb[10].mxu0 }
 0xf35   :  { %v1835_v41 = vadd.f32 %v2197_v40, %v1762_v39  ;;  %v1829_v42 = vpop.f32.mrb[11].mxu0 }
 0xf36   :  { %v1830_v43 = vadd.f32 %v1829_v42, %v1762_v39 }
 0xf37   :  { %v1839_v44 = vadd.f32 %v1835_v41, %v1645_v22 }
 0xf38   :  { %v1838_v35 = vadd.f32 %v1830_v43, %v1644_v25 }
 0xf39   :  { %1842 = vadd.xlane.f32.xlu0 %v1839_v44 }
 0xf3a   :  { %1840 = vadd.xlane.f32.xlu1 %v1838_v35 }
 0xfc6   :  { %v1843_v45 = vpop.xlane.xlu0 %1842 }
 0xfc7   :  { %v1845_v46 = vmul.f32 0.03125, %v1843_v45  ;;  %v1841_v47 = vpop.xlane.xlu1 %1840 }
 0xfc8   :  { %v1844_v48 = vmul.f32 0.03125, %v1841_v47 }
 0xfc9   :  { %v1847_v49 = vsub.f32 %v1839_v44, %v1845_v46 }
 0xfca   :  { %v1846_v50 = vsub.f32 %v1838_v35, %v1844_v48 }
 0xfcb   :  { %v1849_v51 = vmul.f32 %v1847_v49, %v2712_v9 }
 0xfcc   :  { %v1848_v52 = vmul.f32 %v1846_v50, %v2712_v9  ;;  %v1867_v9 = vrot.slane %v2563_v30, %v1866_v61 }
 0xfcd   :  { %v1851_v53 = vmul.f32 %v1849_v51, %v1849_v51 }
 0xfce   :  { %v1850_v54 = vmul.f32 %v1848_v52, %v1848_v52 }
 0xfcf   :  { %1854 = vadd.xlane.f32.xlu0 %v1851_v53 }
 0xfd0   :  { %1852 = vadd.xlane.f32.xlu1 %v1850_v54 }
0x105c   :  { %v1855_v55 = vpop.xlane.xlu0 %1854 }
0x105d   :  { %v1857_v56 = vmul.f32 0.03125, %v1855_v55  ;;  %v1853_v57 = vpop.xlane.xlu1 %1852 }
0x105e   :  { %v1856_v58 = vmul.f32 0.03125, %v1853_v57 }
0x105f   :  { %v1859_v59 = vadd.f32 1e-05, %v1857_v56 }
0x1060   :  { %v1858_v60 = vadd.f32 1e-05, %v1856_v58 }
0x1061   :  { %2358 = vrsqrt.f32 %v1859_v59 }
0x1062   :  { %2360 = vrsqrt.f32 %v1858_v60 }
0x106b   :  { %v2359_v63 = vpop.eup %2358 }
0x106c   :  { %v2361_v0 = vpop.eup %2360  ;;  %v1863_v3 = vmul.f32 %v2359_v63, %v1849_v51 }
0x106d   :  { %v1862_v5 = vmul.f32 %v2361_v0, %v1848_v52 }
0x106e   :  { %v1869_v2 = vmul.f32 %v1867_v9, %v1863_v3 }
0x106f   :  { %v1868_v6 = vmul.f32 %v1867_v9, %v1862_v5 }
0x1070   :  { %v1875_v7 = vadd.f32 %v1873_v1, %v1869_v2 }
0x1071   :  { %v1874_v8 = vadd.f32 %v1873_v1, %v1868_v6 }
0x1072   :  { %1877 = vst [vmem:[%s2755_s6 + $0x8] sm:$0xff] %v1875_v7 }
0x1073   :  { %1876 = vst [vmem:[%s2755_s6] sm:$0xff] %v1874_v8 }
0x1074   :  { %1882 = vsyncpa [#allocation3], 1 }
0x1075   :  { %1883 = vsyncpa [#allocation5], 1 }

</bundles_post_ra>
